<compile_context>
chip_gen: v6e
topology: v6e:2x2x1
jax: 0.10.0
libtpu: 0.0.40
codegen_flags: <defaults>
</compile_context>

<pallas_src>
import jax
import jax.numpy as jnp
from jax import lax
from jax.experimental import pallas as pl
from jax.experimental.pallas import tpu as pltpu


def channel_attention_kernel(beta_ref, x_ref, o_ref):
    # beta_ref: SMEM (1,) float32
    # x_ref / o_ref: VMEM (TB, C, HW) blocks
    x = x_ref[...]                                    # native dtype, no f32 copy

    # Channel Gram matrix: s[b, i, k] = sum_j x[b, i, j] * x[b, k, j]
    # Contract the lane (HW) axis of both operands — no explicit transpose.
    s = lax.dot_general(
        x, x,
        dimension_numbers=(((2,), (2,)), ((0,), (0,))),
        preferred_element_type=jnp.float32,
    )                                                 # (TB, C, C) f32

    # Softmax over the last axis (dim=2 of the (b, c, c) scores).
    m = jnp.max(s, axis=-1, keepdims=True)
    e = jnp.exp(s - m)
    a = e * pl.reciprocal(jnp.sum(e, axis=-1, keepdims=True), approx=True)

    # Fold beta into the small (C, C) matrix — avoids a full (C, HW)-sized
    # VPU multiply in the epilogue.
    p = (beta_ref[0] * a).astype(x.dtype)             # (TB, C, C)

    # out[b, i, k] = sum_j p[b, j, i] * x[b, j, k]   (== A^T @ x, transposed
    # LHS handled natively by the MXU — no explicit transpose of the map).
    out = lax.dot_general(
        p, x,
        dimension_numbers=(((1,), (1,)), ((0,), (0,))),
        preferred_element_type=jnp.float32,
    )                                                 # (TB, C, HW) f32

    # Residual: beta is already folded into `out`, so just add x.
    o_ref[...] = (out + x.astype(jnp.float32)).astype(o_ref.dtype)


def _pick_batch_tile(b, c, hw, itemsize):
    """Pick TB (batch elements per grid step).

    Prefer blocks of a few MiB so tiny per-batch tensors are batched together
    (big lane-dense DMAs, fewer grid steps).  When each batch element is
    already large, keep at least 2 grid steps so the v7x megacore can shard
    the (parallel) batch axis across its 2 TensorCores.
    """
    per_elem = c * hw * itemsize
    budget = 4 << 20                                  # ~4 MiB per input block
    tb = min(b, max(1, budget // max(per_elem, 1)))
    while b % tb:
        tb -= 1
    if b // tb < 2 and b >= 2 and per_elem * (b // 2) >= (512 << 10):
        tb = b // 2
        while b % tb:
            tb -= 1
    return tb


def channel_attention(x, beta):
    """x: (B, C, H, W) array; beta: scalar parameter (shape (1,))."""
    b, c, h, w = x.shape
    hw = h * w
    x_flat = x.reshape(b, c, hw)
    beta = jnp.asarray(beta, dtype=jnp.float32).reshape(1)

    itemsize = jnp.dtype(x.dtype).itemsize
    tb = _pick_batch_tile(b, c, hw, itemsize)

    # Explicit VMEM budget: double-buffered in + out blocks, plus f32 temps
    # (dot accumulator and the (C, C) scores).  Capped at the v7x scoped
    # default so the same call is safe across v5e/v6e/v7x.
    block_bytes = tb * c * hw * itemsize
    temp_bytes = tb * c * hw * 4 + 2 * tb * c * c * 4
    vmem_limit = min(max(4 * block_bytes + temp_bytes + (1 << 20), 16 << 20),
                     32 << 20)

    out_flat = pl.pallas_call(
        channel_attention_kernel,
        out_shape=jax.ShapeDtypeStruct((b, c, hw), x.dtype),
        grid_spec=pl.GridSpec(
            grid=(b // tb,),
            in_specs=[
                pl.BlockSpec(memory_space=pltpu.MemorySpace.SMEM),   # beta
                pl.BlockSpec((tb, c, hw), lambda i: (i, 0, 0)),      # x
            ],
            out_specs=pl.BlockSpec((tb, c, hw), lambda i: (i, 0, 0)),
        ),
        compiler_params=pltpu.CompilerParams(
            dimension_semantics=("parallel",),
            vmem_limit_bytes=vmem_limit,
        ),
    )(beta, x_flat)

    # TODO(synk): for very large C*HW (single block exceeding the VMEM budget)
    # switch to a two-pass structure that tiles the HW axis: pass 1 accumulates
    # the (C, C) Gram in scratch across HW tiles, pass 2 applies softmax(A)^T
    # per HW tile.  Not needed at these shapes.
    return out_flat.reshape(b, c, h, w)


def channel_attention_ref(x, beta):
    """Pure-JAX reference mirroring the PyTorch forward."""
    b, c, h, w = x.shape
    xf = x.reshape(b, c, h * w).astype(jnp.float32)
    s = jnp.einsum("bij,bkj->bik", xf, xf)            # (b, c, c)
    a = jax.nn.softmax(s, axis=2)
    out = jnp.einsum("bji,bjk->bik", a, xf)           # A.transpose(1,2) @ xf
    out = out.reshape(b, c, h, w)
    return (beta.reshape(()) * out + x.astype(jnp.float32)).astype(x.dtype)


if __name__ == "__main__":
    key = jax.random.PRNGKey(0)
    B, C, H, W = 2, 4, 16, 16
    x = jax.random.normal(key, (B, C, H, W), dtype=jnp.float32)

    # Parameter init matching module __init__: beta = 0.0 (shape (1,)).
    # Also use a nonzero value so the attention path is actually exercised.
    beta_zero = jnp.zeros((1,), dtype=jnp.float32)
    beta_test = jnp.full((1,), 0.5, dtype=jnp.float32)

    for beta in (beta_zero, beta_test):
        out = channel_attention(x, beta)
        out = jax.block_until_ready(out)
        ref = channel_attention_ref(x, beta)
        assert out.shape == (B, C, H, W)
        # Tolerance accounts for the EUP approximate reciprocal in softmax.
        assert jnp.allclose(out, ref, atol=2e-3, rtol=2e-3), (
            f"mismatch: max abs err = {jnp.max(jnp.abs(out - ref))}"
        )

    print("KERNEL_OK")
</pallas_src>

<mosaic_0001>
module attributes {stable_mosaic.version = 11 : i64} {
  func.func @channel_attention_kernel(%arg0: i32, %arg1: memref<1xf32, #tpu.memory_space<smem>>, %arg2: memref<2x4x256xf32, #tpu.memory_space<vmem>>, %arg3: memref<2x4x256xf32, #tpu.memory_space<vmem>>) attributes {dimension_semantics = [#tpu.dimension_semantics<parallel>], iteration_bounds = array<i64: 1>, scalar_prefetch = 0 : i64, scratch_operands = 0 : i64, tpu.core_type = #tpu.core_type<tc>, window_params = [{transform_indices = @transform_0, window_bounds = array<i64: 1>}, {transform_indices = @transform_1, window_bounds = array<i64: 2, 4, 256>}, {transform_indices = @transform_2, window_bounds = array<i64: 2, 4, 256>}]} {
    %c0 = arith.constant 0 : index
    %c0_0 = arith.constant 0 : index
    %c0_1 = arith.constant 0 : index
    %0 = vector.load %arg2[%c0, %c0_0, %c0_1] : memref<2x4x256xf32, #tpu.memory_space<vmem>>, vector<2x4x256xf32>
    %cst = arith.constant dense<0.000000e+00> : vector<2x4x4xf32>
    %1 = tpu.matmul %0, %0, %cst {dimension_numbers = #tpu.dot_dimension_numbers<[2], [2], [1], [1], [0, 0, 0, 1, 1, 1], [0], [0]>} : vector<2x4x256xf32>, vector<2x4x256xf32>, vector<2x4x4xf32> -> vector<2x4x4xf32>
    %cst_2 = arith.constant dense<0xFF800000> : vector<2x4xf32>
    %2 = vector.multi_reduction <maximumf>, %1, %cst_2 [2] : vector<2x4x4xf32> to vector<2x4xf32>
    %3 = vector.shape_cast %2 : vector<2x4xf32> to vector<2x4x1xf32>
    %4 = vector.broadcast %3 : vector<2x4x1xf32> to vector<2x4x4xf32>
    %5 = arith.subf %1, %4 : vector<2x4x4xf32>
    %6 = math.exp %5 : vector<2x4x4xf32>
    %cst_3 = arith.constant dense<0.000000e+00> : vector<2x4xf32>
    %7 = vector.multi_reduction <add>, %6, %cst_3 [2] : vector<2x4x4xf32> to vector<2x4xf32>
    %8 = vector.shape_cast %7 : vector<2x4xf32> to vector<2x4x1xf32>
    %9 = tpu.reciprocal %8 {approx = true} : vector<2x4x1xf32> -> vector<2x4x1xf32>
    %10 = vector.broadcast %9 : vector<2x4x1xf32> to vector<2x4x4xf32>
    %11 = arith.mulf %6, %10 : vector<2x4x4xf32>
    %c0_4 = arith.constant 0 : index
    %12 = memref.load %arg1[%c0_4] : memref<1xf32, #tpu.memory_space<smem>>
    %13 = vector.broadcast %12 : f32 to vector<2x4x4xf32>
    %14 = arith.mulf %13, %11 : vector<2x4x4xf32>
    %cst_5 = arith.constant dense<0.000000e+00> : vector<2x4x256xf32>
    %15 = tpu.matmul %14, %0, %cst_5 {dimension_numbers = #tpu.dot_dimension_numbers<[1], [1], [2], [2], [0, 0, 0, 2, 1, 2], [0], [0]>} : vector<2x4x4xf32>, vector<2x4x256xf32>, vector<2x4x256xf32> -> vector<2x4x256xf32>
    %16 = arith.addf %15, %0 : vector<2x4x256xf32>
    %c0_6 = arith.constant 0 : index
    %c0_7 = arith.constant 0 : index
    %c0_8 = arith.constant 0 : index
    %17 = vector.load %arg3[%c0_6, %c0_7, %c0_8] : memref<2x4x256xf32, #tpu.memory_space<vmem>>, vector<2x4x256xf32>
    tpu.vector_store %arg3[%c0_6, %c0_7, %c0_8], %16 {strides = array<i32>} : memref<2x4x256xf32, #tpu.memory_space<vmem>>, vector<2x4x256xf32>,
    return
  }
  func.func @transform_0(%arg0: i32) -> i32 {
    %c0_i32 = arith.constant 0 : i32
    %c0_i32_0 = arith.constant 0 : i32
    return %c0_i32 : i32
  }
  func.func @transform_1(%arg0: i32) -> (i32, i32, i32) {
    %c0_i32 = arith.constant 0 : i32
    %c0_i32_0 = arith.constant 0 : i32
    %c0_i32_1 = arith.constant 0 : i32
    return %arg0, %c0_i32, %c0_i32_0 : i32, i32, i32
  }
  func.func @transform_2(%arg0: i32) -> (i32, i32, i32) {
    %c0_i32 = arith.constant 0 : i32
    %c0_i32_0 = arith.constant 0 : i32
    %c0_i32_1 = arith.constant 0 : i32
    return %arg0, %c0_i32, %c0_i32_0 : i32, i32, i32
  }
}

</mosaic_0001>

<bundles_post_ra>
// kernel: tpu_custom_call.1
= control target key start
LH: loop header
LB: loop body
LE: loop exit
PB: predicated region body
PF: predicated region fallthrough
CT: control target
= control target key end

     0   :  { %8 = vsyncpa [#allocation4], 0  ;;  %s569_s0 = inlined_call_operand.<no memory space> [shape: f32[1], index: 0, kind: input, shape index: {}]   ;;  %s570_s1 = inlined_call_operand.hbm [shape: f32[2,4,256], index: 1, kind: input, shape index: {}]   ;;  %s571_s2 = inlined_call_operand.hbm [shape: f32[2,4,256], index: 2, kind: output, shape index: {}]  }
   0x1   :  { %9 = vsyncpa [#allocation5], 0  ;;  %s516_s9 = smov [#allocation3]  }
   0x2   :  { %s17_s10 = sshll.u32 %s516_s9, 4  ;;  %s18_s10 = int_to_ptr.vmem [resolvable:$true] %s17_s10 }
   0x3   :  { %s480_s11 = scalar_lea.vmem %s18_s10, 256  ;;  %p485_p1 = scmp.lt.s32.totalorder %s18_s10, %s18_s10 }
   0x4   :  { %p481_p0 = scmp.ne.s32.totalorder %s18_s10, %s480_s11  ;;  %p486_p2 = scmp.lt.s32.totalorder %s480_s11, %s480_s11 }
   0x6   :  { %p487_p3 = por %p486_p2, %p485_p1 }
   0x8   :  { %p488_p4 = pnand %p487_p3, %p481_p0 }
   0xa   :  { %491 = shalt.err (!%p488_p4)
}
   0xb   :  { %s517_s12 = smov 128   ;;  %s518_s13 = smov 8  }
   0xc   :  { %23 = dma.hbm_to_vmem [thread:$0]  %s570_s1, 256, %s18_s10, [#allocation4], %s517_s12, %s517_s12, %s518_s13  }
   0xd   :  { %512 = dma.done.wait [#allocation4], 256  }
   0xe   :  { %513 = vsyncadd [#allocation4], 4294967040  ;;  %v27_v0 = vld [vmem:[#allocation3] sm:$0xff]  ;;  %v542_v1 = vld [vmem:[#allocation3 + $0x8] sm:$0xff]  ;;  %vm175_vm0 = vcmask 27648   ;;  %vm238_vm1 = vcmask 1043456   ;;  %v199_v24 = vstv %s569_s0 }
   0xf   :  { %v30_v2 = vcombine.high %v27_v0, %v27_v0  ;;  %v546_v3 = vcombine.high %v542_v1, %v542_v1  ;;  %v519_v20 = vmov 0.0   ;;  %vm234_vm2 = vcmask 31744   ;;  %s520_s0 = smov [#allocation6]  }
  0x10   :  { %s439_s17 = sshll.u32 %s520_s0, 4  ;;  %s440_s17 = int_to_ptr.vmem [resolvable:$true] %s439_s17 }
  0x11   :  { %62 = vmatprep.subr.mxu0 %v30_v2  ;;  %135 = vmatprep.subr.mxu1 %v546_v3  ;;  %s492_s18 = scalar_lea.vmem %s440_s17, 256  ;;  %p497_p6 = scmp.lt.s32.totalorder %s440_s17, %s440_s17 }
  0x12   :  { %63 = vmatpush1.xpose.msra.mxu0 %v27_v0  ;;  %96 = vmatprep.mubr.f32.mxu0 %v30_v2  ;;  %p493_p5 = scmp.ne.s32.totalorder %s440_s17, %s492_s18  ;;  %p498_p7 = scmp.lt.s32.totalorder %s492_s18, %s492_s18 }
  0x13   :  { %136 = vmatpush1.xpose.msra.mxu1 %v542_v1  ;;  %169 = vmatprep.mubr.f32.mxu1 %v546_v3 }
  0x14   :  { %451 = vmatprep.subr.msk.mxu0 %vm238_vm1, %v30_v2  ;;  %454 = vmatprep.subr.msk.mxu1 %vm238_vm1, %v546_v3  ;;  %p499_p8 = por %p498_p7, %p497_p6 }
  0x15   :  { %97 = vmatmul.mubr.f32.vlgmr.msra.gmra.mxu0 %v27_v0 }
  0x16   :  { %170 = vmatmul.mubr.f32.vlgmr.msra.gmra.mxu1 %v542_v1  ;;  %452 = vmatpush1.msk.msra.mxu0 %vm238_vm1, %v27_v0  ;;  %p500_p9 = pnand %p499_p8, %p493_p5 }
  0x17   :  { %455 = vmatpush1.msk.msra.mxu1 %vm238_vm1, %v542_v1  ;;  %307 = vmatprep.mubr.f32.mxu0 %v519_v20 }
  0x18   :  { %417 = vmatprep.mubr.f32.mxu1 %v519_v20 }
  0xd5   :  { %v98_v4 = vpop.f32.mrf.mxu0 }
  0xd6   :  { %v171_v5 = vpop.f32.mrf.mxu1  ;;  %v176_v6 = vsel %vm175_vm0, %v98_v4, -inf }
  0xd7   :  { %177 = vmax.xlane.f32.xlu0 %v176_v6  ;;  %v100_v7 = vpop.f32.mrf.mxu0  ;;  %v179_v9 = vsel %vm175_vm0, %v171_v5, -inf }
  0xd8   :  { %v173_v8 = vpop.f32.mrf.mxu1 }
  0xdb   :  { %180 = vmax.xlane.f32.xlu0 %v179_v9 }
 0x160   :  { %v178_v10 = vpop.xlane.xlu0 %177 }
 0x161   :  { %v182_v11 = vsub.f32 %v98_v4, %v178_v10 }
 0x163   :  { %v184_v12 = vmul.f32 1.442695, %v182_v11 }
 0x164   :  { %v181_v13 = vpop.xlane.xlu0 %180 }
 0x165   :  { %464 = vpow2.f32 %v184_v12  ;;  %v183_v14 = vsub.f32 %v171_v5, %v181_v13 }
 0x167   :  { %v186_v15 = vmul.f32 1.442695, %v183_v14 }
 0x169   :  { %466 = vpow2.f32 %v186_v15 }
 0x172   :  { %v465_v16 = vpop.eup %464 }
 0x173   :  { %v188_v17 = vsel %vm175_vm0, %v465_v16, 0.0 }
 0x174   :  { %189 = vadd.xlane.f32.xlu1 %v188_v17 }
 0x176   :  { %v467_v18 = vpop.eup %466 }
 0x177   :  { %v191_v19 = vsel %vm175_vm0, %v467_v18, 0.0 }
 0x178   :  { %192 = vadd.xlane.f32.xlu1 %v191_v19 }
 0x1fd   :  { %v190_v21 = vpop.xlane.xlu1 %189 }
 0x1fe   :  { %468 = vrcp.f32 %v190_v21 }
 0x201   :  { %v193_v22 = vpop.xlane.xlu1 %192 }
 0x202   :  { %470 = vrcp.f32 %v193_v22 }
 0x20b   :  { %v469_v23 = vpop.eup %468 }
 0x20c   :  { %v196_v25 = vmul.f32 %v469_v23, %v465_v16 }
 0x20e   :  { %v200_v26 = vmul.f32 %v199_v24, %v196_v25 }
 0x20f   :  { %v471_v27 = vpop.eup %470 }
 0x210   :  { %202 = vxpose.xlu0.b32.start.end [1/1] (short) (narrow) %v200_v26, 8  ;;  %v197_v28 = vmul.f32 %v471_v27, %v467_v18 }
 0x212   :  { %v201_v29 = vmul.f32 %v199_v24, %v197_v28 }
 0x214   :  { %314 = vxpose.xlu1.b32.start.end [1/1] (short) (narrow) %v201_v29, 8 }
 0x28c   :  { %v218_v30 = vpop.trf.xlu0 }
 0x28d   :  { %453 = vmatmul.mubr.msk.f32.vlgmr.msra.gmra.mxu0 %vm234_vm2, %v218_v30 }
 0x290   :  { %v330_v31 = vpop.trf.xlu1 }
 0x291   :  { %456 = vmatmul.mubr.msk.f32.vlgmr.msra.gmra.mxu1 %vm234_vm2, %v330_v31 }
 0x34d   :  { %v309_v32 = vpop.f32.mrf.mxu0 }
 0x34e   :  { %v310_v33 = vadd.f32 %v309_v32, %v27_v0 }
 0x34f   :  { %v311_v34 = vpop.f32.mrf.mxu0 }
 0x350   :  { %v312_v35 = vadd.f32 %v311_v34, %v30_v2 }
 0x351   :  { %v419_v36 = vpop.f32.mrf.mxu1 }
 0x352   :  { %v428_v37 = vcombine.low %v310_v33, %v312_v35  ;;  %v420_v39 = vadd.f32 %v419_v36, %v542_v1 }
 0x353   :  { %v421_v38 = vpop.f32.mrf.mxu1 }
 0x354   :  { %432 = vst [vmem:[#allocation6] sm:$0xff] %v428_v37  ;;  %v422_v40 = vadd.f32 %v421_v38, %v546_v3 }
 0x356   :  { %v429_v41 = vcombine.low %v420_v39, %v422_v40 }
 0x358   :  { %433 = vst [vmem:[#allocation6 + $0x8] sm:$0xff] %v429_v41 }
 0x359   :  { %503 = shalt.err (!%p500_p9)
}
 0x35a   :  { %445 = dma.vmem_to_hbm [thread:$0]  %s440_s17, 256, %s571_s2, [#allocation5], %s517_s12, %s517_s12, %s518_s13  }
 0x35b   :  { %514 = dma.done.wait [#allocation5], 256  }
 0x35c   :  { %515 = vsyncadd [#allocation5], 4294967040 }
 0x35d   :  { %449 = vsyncpa [#allocation4], 1 }
 0x35e   :  { %450 = vsyncpa [#allocation5], 1 }

</bundles_post_ra>
